<compile_context>
chip_gen: v7x
topology: tpu7x:2x2x1
jax: 0.10.0
libtpu: 0.0.40
codegen_flags: <defaults>
</compile_context>

<pallas_src>
import jax
import jax.numpy as jnp
from jax.experimental import pallas as pl
from jax.experimental.pallas import tpu as pltpu

_LANE = 128      # lane width: last dim of every block padded to a multiple of this
_SUBLANE = 8     # sublane count: second-to-last dim padded to a multiple of this


def _round_up(n, m):
    return ((n + m - 1) // m) * m


def _linear_kernel(x_ref, w_ref, b_ref, o_ref):
    # x_ref: (B_pad, F_pad), w_ref: (F_pad, R_pad), b_ref: (1, R_pad)
    # Single MXU pass with f32 accumulation; bias add + store on the VPU.
    acc = jnp.dot(x_ref[...], w_ref[...], preferred_element_type=jnp.float32)
    o_ref[...] = (acc + b_ref[...]).astype(o_ref.dtype)


def make_weights_generator(weight, bias):
    """One-time parameter prep + jitted forward.

    weight: (n_ranks, n_feats)  -- torch nn.Linear convention
    bias:   (n_ranks,)
    Returns forward(x) with x: (B, n_feats) -> (B, n_ranks), matching
    WeightsGenerator.forward (i.e. x @ weight.T + bias).
    """
    n_ranks, n_feats = weight.shape
    f_pad = _round_up(n_feats, _LANE)
    r_pad = _round_up(n_ranks, _LANE)

    # Hoisted, done exactly once: transpose to (n_feats, n_ranks), zero-pad to
    # lane-dense shapes.
    w_t = jnp.asarray(weight, dtype=jnp.float32).T                 # (n_feats, n_ranks)
    w_t_pad = jnp.pad(w_t, ((0, f_pad - n_feats), (0, r_pad - n_ranks)))
    b_pad = jnp.pad(jnp.asarray(bias, dtype=jnp.float32), (0, r_pad - n_ranks))
    b_pad = b_pad.reshape(1, r_pad)

    @jax.jit
    def forward(x):
        B, nf = x.shape
        assert nf == n_feats, f"expected n_feats={n_feats}, got {nf}"
        b_rows = _round_up(max(B, _SUBLANE), _SUBLANE)

        # Sublane-align the batch and lane-align the feature dim (zeros -> exact).
        x_pad = jnp.pad(x.astype(jnp.float32),
                        ((0, b_rows - B), (0, f_pad - n_feats)))

        out_pad = pl.pallas_call(
            _linear_kernel,
            out_shape=jax.ShapeDtypeStruct((b_rows, r_pad), jnp.float32),
            in_specs=[
                pl.BlockSpec((b_rows, f_pad), lambda: (0, 0)),
                pl.BlockSpec((f_pad, r_pad), lambda: (0, 0)),
                pl.BlockSpec((1, r_pad), lambda: (0, 0)),
            ],
            out_specs=pl.BlockSpec((b_rows, r_pad), lambda: (0, 0)),
            compiler_params=pltpu.CompilerParams(
                dimension_semantics=(),          # no grid: single block
            ),
        )(x_pad, w_t_pad, b_pad)

        return out_pad[:B, :n_ranks]

    return forward


if __name__ == "__main__":
    # Small shapes consistent with the module: batch=2, n_feats=32, n_ranks=8.
    B, n_feats, n_ranks = 2, 32, 8

    key = jax.random.PRNGKey(0)
    kx, kw, kb = jax.random.split(key, 3)

    x = jax.random.normal(kx, (B, n_feats), dtype=jnp.float32)
    # The module's init_weights() zeros everything (trivial output); use small
    # deterministic random params so the matmul path is actually exercised.
    weight = jax.random.normal(kw, (n_ranks, n_feats), dtype=jnp.float32) * 0.05
    bias = jax.random.normal(kb, (n_ranks,), dtype=jnp.float32) * 0.05

    forward = make_weights_generator(weight, bias)
    out = jax.block_until_ready(forward(x))

    # Reference check (== torch.nn.Linear semantics).
    ref = x @ weight.T + bias
    assert out.shape == (B, n_ranks), out.shape
    assert jnp.allclose(out, ref, atol=1e-5, rtol=1e-5), (
        float(jnp.max(jnp.abs(out - ref))))

    print("KERNEL_OK")
</pallas_src>

<mosaic_0001>
module attributes {stable_mosaic.version = 11 : i64} {
  func.func @_linear_kernel(%arg0: memref<8x128xf32, #tpu.memory_space<vmem>>, %arg1: memref<128x128xf32, #tpu.memory_space<vmem>>, %arg2: memref<1x128xf32, #tpu.memory_space<vmem>>, %arg3: memref<8x128xf32, #tpu.memory_space<vmem>>) attributes {dimension_semantics = [], scalar_prefetch = 0 : i64, scratch_operands = 0 : i64, tpu.core_type = #tpu.core_type<tc>} {
    %c0 = arith.constant 0 : index
    %c0_0 = arith.constant 0 : index
    %0 = vector.load %arg0[%c0, %c0_0] : memref<8x128xf32, #tpu.memory_space<vmem>>, vector<8x128xf32>
    %c0_1 = arith.constant 0 : index
    %c0_2 = arith.constant 0 : index
    %1 = vector.load %arg1[%c0_1, %c0_2] : memref<128x128xf32, #tpu.memory_space<vmem>>, vector<128x128xf32>
    %cst = arith.constant dense<0.000000e+00> : vector<8x128xf32>
    %2 = tpu.matmul %0, %1, %cst {dimension_numbers = #tpu.dot_dimension_numbers<[1], [0], [0], [1], [0, 0, 1, 1], [], []>} : vector<8x128xf32>, vector<128x128xf32>, vector<8x128xf32> -> vector<8x128xf32>
    %c0_3 = arith.constant 0 : index
    %c0_4 = arith.constant 0 : index
    %3 = vector.load %arg2[%c0_3, %c0_4] : memref<1x128xf32, #tpu.memory_space<vmem>>, vector<1x128xf32>
    %4 = vector.broadcast %3 : vector<1x128xf32> to vector<8x128xf32>
    %5 = arith.addf %2, %4 : vector<8x128xf32>
    %c0_5 = arith.constant 0 : index
    %c0_6 = arith.constant 0 : index
    %6 = vector.load %arg3[%c0_5, %c0_6] : memref<8x128xf32, #tpu.memory_space<vmem>>, vector<8x128xf32>
    tpu.vector_store %arg3[%c0_5, %c0_6], %5 {strides = array<i32>} : memref<8x128xf32, #tpu.memory_space<vmem>>, vector<8x128xf32>,
    return
  }
}

</mosaic_0001>

<bundles_post_ra>
// kernel: forward.1
= control target key start
LH: loop header
LB: loop body
LE: loop exit
PB: predicated region body
PF: predicated region fallthrough
CT: control target
= control target key end

     0   :  { %8 = vsyncpa [#allocation3], 0  ;;  %s235_s12 = smov [#allocation2]   ;;  %s282_s0 = inlined_call_operand.vmem [shape: f32[8,128], index: 0, kind: input, shape index: {}]   ;;  %s283_s1 = inlined_call_operand.hbm [shape: f32[128,128], index: 1, kind: input, shape index: {}]   ;;  %s284_s2 = inlined_call_operand.vmem [shape: f32[1,128], index: 2, kind: input, shape index: {}]   ;;  %s285_s3 = inlined_call_operand.vmem [shape: f32[8,128], index: 3, kind: output, shape index: {}]  }
   0x1   :  { %s16_s13 = sshll.u32 %s235_s12, 4  ;;  %s211_s16 = scalar_lea.hbm %s283_s1, 2048  ;;  %s17_s13 = int_to_ptr.vmem [resolvable:$true] %s16_s13 }
   0x2   :  { %p212_p0 = scmp.ne.s32.totalorder %s283_s1, %s211_s16  ;;  %p215_p1 = scmp.lt.u32.totalorder %s211_s16, %s283_s1 }
   0x4   :  { %p217_p2 = pnand %p215_p1, %p212_p0 }
   0x6   :  { %220 = shalt.err (!%p217_p2)
}
   0x7   :  { %s221_s21 = scalar_lea.vmem %s17_s13, 2048  ;;  %p226_p4 = scmp.lt.s32.totalorder %s17_s13, %s17_s13 }
   0x8   :  { %p222_p3 = scmp.ne.s32.totalorder %s17_s13, %s221_s21  ;;  %p227_p5 = scmp.lt.s32.totalorder %s221_s21, %s221_s21 }
   0xa   :  { %p228_p6 = por %p227_p5, %p226_p4 }
   0xc   :  { %p229_p7 = pnand %p228_p6, %p222_p3 }
   0xe   :  { %232 = shalt.err (!%p229_p7)
}
   0xf   :  { %s236_s22 = smov 128   ;;  %s237_s23 = smov 8  }
  0x10   :  { %22 = dma.hbm_to_vmem [thread:$0]  %s283_s1, 2048, %s17_s13, [#allocation3], %s236_s22, %s236_s22, %s237_s23  }
  0x11   :  { %233 = dma.done.wait [#allocation3], 2048  }
  0x12   :  { %234 = vsyncadd [#allocation3], 4294965248  ;;  %v238_v0 = vmov 0.0|0.0   ;;  %vm239_vm0 = vmmov 0   ;;  %v240_v1 = vmov 0.0   ;;  %v29_v2 = vld [vmem:[#allocation2] sm:$0xff] }
  0x13   :  { %181 = vmatprep.subr.bf16.mxu0 %v238_v0  ;;  %178 = vmatprep.mubr.msk.f32.mxu0 %vm239_vm0, %v240_v1  ;;  %v30_v3 = vld [vmem:[#allocation2 + $0x8] sm:$0xff]  ;;  %v31_v4 = vld [vmem:[#allocation2 + $0x10] sm:$0xff]  ;;  %v32_v6 = vld [vmem:[#allocation2 + $0x18] sm:$0xff] }
  0x14   :  { %v182_v5 = vpack.c.bf16 %v30_v3, %v29_v2  ;;  %v185_v7 = vpack.c.bf16 %v32_v6, %v31_v4  ;;  %v33_v8 = vld [vmem:[#allocation2 + $0x20] sm:$0xff]  ;;  %v34_v9 = vld [vmem:[#allocation2 + $0x28] sm:$0xff]  ;;  %v35_v11 = vld [vmem:[#allocation2 + $0x30] sm:$0xff] }
  0x15   :  { %v188_v10 = vpack.c.bf16 %v34_v9, %v33_v8  ;;  %v36_v12 = vld [vmem:[#allocation2 + $0x38] sm:$0xff]  ;;  %v37_v14 = vld [vmem:[#allocation2 + $0x40] sm:$0xff]  ;;  %v38_v15 = vld [vmem:[#allocation2 + $0x48] sm:$0xff] }
  0x16   :  { %183 = vmatpush3.bf16.msra.mxu0 %v182_v5  ;;  %v191_v13 = vpack.c.bf16 %v36_v12, %v35_v11  ;;  %v194_v16 = vpack.c.bf16 %v38_v15, %v37_v14  ;;  %v39_v17 = vld [vmem:[#allocation2 + $0x50] sm:$0xff]  ;;  %v40_v18 = vld [vmem:[#allocation2 + $0x58] sm:$0xff]  ;;  %v41_v20 = vld [vmem:[#allocation2 + $0x60] sm:$0xff] }
  0x17   :  { %184 = vmatprep.subr.bf16.mxu0 %v238_v0  ;;  %v197_v19 = vpack.c.bf16 %v40_v18, %v39_v17  ;;  %v42_v21 = vld [vmem:[#allocation2 + $0x68] sm:$0xff]  ;;  %v43_v23 = vld [vmem:[#allocation2 + $0x70] sm:$0xff]  ;;  %v44_v24 = vld [vmem:[#allocation2 + $0x78] sm:$0xff] }
  0x18   :  { %v200_v22 = vpack.c.bf16 %v42_v21, %v41_v20  ;;  %v203_v25 = vpack.c.bf16 %v44_v24, %v43_v23  ;;  %v28_v26 = vld [vmem:[%s282_s0] sm:$0xff] }
  0x19   :  { %v128_v27 = vld [vmem:[%s284_s2] ss:$0 sm:$0xff] }
  0x1a   :  { %186 = vmatpush3.bf16.msra.mxu0 %v185_v7 }
  0x1b   :  { %187 = vmatprep.subr.bf16.mxu0 %v238_v0 }
  0x1e   :  { %189 = vmatpush3.bf16.msra.mxu0 %v188_v10 }
  0x1f   :  { %190 = vmatprep.subr.bf16.mxu0 %v238_v0 }
  0x22   :  { %192 = vmatpush3.bf16.msra.mxu0 %v191_v13 }
  0x23   :  { %193 = vmatprep.subr.bf16.mxu0 %v238_v0 }
  0x26   :  { %195 = vmatpush3.bf16.msra.mxu0 %v194_v16 }
  0x27   :  { %196 = vmatprep.subr.bf16.mxu0 %v238_v0 }
  0x2a   :  { %198 = vmatpush3.bf16.msra.mxu0 %v197_v19 }
  0x2b   :  { %199 = vmatprep.subr.bf16.mxu0 %v238_v0 }
  0x2e   :  { %201 = vmatpush3.bf16.msra.mxu0 %v200_v22 }
  0x2f   :  { %202 = vmatprep.subr.bf16.mxu0 %v238_v0 }
  0x32   :  { %204 = vmatpush3.bf16.msra.mxu0 %v203_v25 }
  0x35   :  { %179 = vmatmul.mubr.f32.vlgmr.msra.gmra.mrb[0].mxu0 %v28_v26 }
 0x108   :  { %v118_v28 = vpop.f32.mrb[0].mxu0 }
 0x109   :  { %v119_v29 = vadd.f32 %v128_v27, %v118_v28  ;;  %v180_v30 = vpop.f32.mrb[1].mxu0 }
 0x10b   :  { %122 = vst [vmem:[%s285_s3] sm:$0xff] %v119_v29 }
 0x10c   :  { %127 = vsyncpa [#allocation3], 1 }

</bundles_post_ra>
